<compile_context>
chip_gen: v5e
topology: v5e:2x2
jax: 0.10.0
libtpu: 0.0.40
codegen_flags: <defaults>
</compile_context>

<pallas_src>
import functools

import jax
import jax.numpy as jnp
import numpy as np
from jax import lax
from jax.experimental import pallas as pl
from jax.experimental.pallas import tpu as pltpu

_LANE = 128
_SUBLANE = 8


def _cdiv(a, b):
    return -(-a // b)


def _detect_num_tensorcores():
    """Best-effort TensorCores-per-device count (v7x: 2, v5e/v6e: 1)."""
    try:
        dev = jax.devices()[0]
        kind = str(getattr(dev, "device_kind", "")).lower()
        n = getattr(dev, "num_cores", None) or getattr(dev, "core_count", None)
        if n is None:
            n = 2 if "v7" in kind else 1
        return max(1, int(n))
    except Exception:
        return 1


def _chip_profile():
    """(target bytes per input block, vmem_limit_bytes) by generation."""
    kind = ""
    try:
        kind = str(jax.devices()[0].device_kind).lower()
    except Exception:
        pass
    if "v5" in kind or "v6" in kind:          # 128 MiB physical VMEM
        return 4 * 1024 * 1024, 64 * 1024 * 1024
    # v7x (64 MiB VMEM) and unknown chips: conservative.
    return 2 * 1024 * 1024, 40 * 1024 * 1024


def _stats_kernel(yp_ref, yt_ref, acc_ref, *, epsilon, ts, tiles_per_core,
                  valid_elems, has_ragged):
    """Accumulate per-(sample, lane) sums of yt*yp, yt, yp over spatial tiles.

    Block shapes:
      yp_ref, yt_ref : (nb, ts, 128)    lane-dense input tiles (any dtype)
      acc_ref        : (1, 3, nb, 128)  resident f32 accumulator for (core, batch-tile)
    """
    p = pl.program_id(0)          # core split
    k = pl.program_id(2)          # spatial (reduction) tile

    @pl.when(k == 0)
    def _init():
        acc_ref[...] = jnp.zeros_like(acc_ref)

    def _accum(mask_tail):
        yp = yp_ref[...].astype(jnp.float32)
        yt = yt_ref[...].astype(jnp.float32)
        yp = jnp.clip(yp, epsilon, 1.0 - epsilon)
        if mask_tail:
            shp = yp.shape
            row0 = (p * tiles_per_core + k) * ts
            rid = row0 + lax.broadcasted_iota(jnp.int32, shp, 1)
            lid = lax.broadcasted_iota(jnp.int32, shp, 2)
            ok = (rid * shp[2] + lid) < valid_elems
            yt = jnp.where(ok, yt, 0.0)
            yp = jnp.where(ok, yp, 0.0)
        # Reduce only the sublane-tile axis; the per-class (lane-parity)
        # reduction happens in the tiny JAX finalize.
        acc_ref[0, 0] += jnp.sum(yt * yp, axis=1)   # sum y_true * y_pred
        acc_ref[0, 1] += jnp.sum(yt, axis=1)        # sum y_true
        acc_ref[0, 2] += jnp.sum(yp, axis=1)        # sum clipped y_pred

    if has_ragged:
        tile = p * tiles_per_core + k
        clean = (tile + 1) * ts * _LANE <= valid_elems

        @pl.when(clean)
        def _():
            _accum(False)

        @pl.when(jnp.logical_not(clean))
        def _():
            _accum(True)
    else:
        _accum(False)


def symmetric_focal_tversky_loss(y_pred, y_true, *, delta=0.7, gamma=0.75,
                                 epsilon=1e-07):
    """y_pred, y_true: (N, H, W, 2) channel-last arrays (f32 / bf16 / int8 one-hot)."""
    n, h, w, c = y_pred.shape
    assert c == 2, "binary segmentation: channel dim must be 2"
    assert y_true.shape == y_pred.shape
    hwc = h * w * c

    itemsize = max(np.dtype(y_pred.dtype).itemsize, np.dtype(y_true.dtype).itemsize)
    target_block, vmem_limit = _chip_profile()

    # Free reshape: flatten H*W*C onto a lane-dense axis; class == lane parity.
    pad128 = (-hwc) % _LANE
    hwc_p = hwc + pad128
    rows = hwc_p // _LANE

    yp2 = y_pred.reshape(n, hwc)
    yt2 = y_true.reshape(n, hwc)
    if pad128:
        # TODO(synk): a fully copy-free path for H*W*C % 128 != 0 needs 2-D
        # lane-axis blocks; here we pad only to the next 128 multiple (rare).
        yp2 = jnp.pad(yp2, ((0, 0), (0, pad128)))
        yt2 = jnp.pad(yt2, ((0, 0), (0, pad128)))
    yp3 = yp2.reshape(n, rows, _LANE)
    yt3 = yt2.reshape(n, rows, _LANE)

    # --- batch tiling keeps block bytes bounded for any N ---
    min_row_bytes = _SUBLANE * _LANE * itemsize
    if n * min_row_bytes <= target_block or n < 2 * _SUBLANE:
        nb = n
    else:
        nb = max(_SUBLANE, (target_block // min_row_bytes) // _SUBLANE * _SUBLANE)
        nb = min(nb, (n // _SUBLANE) * _SUBLANE)
    n_tiles = _cdiv(n, nb)

    # --- spatial (row) tiling: biggest tile within the per-block byte target ---
    ts_cap = max(_SUBLANE,
                 (target_block // (nb * _LANE * itemsize)) // _SUBLANE * _SUBLANE)
    if rows <= _SUBLANE:
        ts = rows                                   # full dim (always legal)
    else:
        ts = min(ts_cap, (rows // _SUBLANE) * _SUBLANE)
    total_tiles = _cdiv(rows, ts)

    detected_cores = min(_detect_num_tensorcores(), 2)

    def run(num_cores, extra_buffer):
        num_cores = max(1, min(num_cores, total_tiles))
        tiles_per_core = _cdiv(total_tiles, num_cores)
        need_clamp = num_cores * tiles_per_core != total_tiles
        has_ragged = (need_clamp
                      or total_tiles * ts != rows
                      or rows * _LANE != hwc)

        core_sem = (getattr(pltpu, "CORE_PARALLEL", pltpu.PARALLEL)
                    if num_cores > 1 else pltpu.ARBITRARY)

        def in_map(p, j, k):
            t = p * tiles_per_core + k
            if need_clamp:
                t = jnp.minimum(t, total_tiles - 1)   # fully-OOB tiles -> dup + mask
            return (j, t, 0)

        bs_kwargs = {}
        if extra_buffer and hasattr(pl, "Buffered"):
            bs_kwargs["pipeline_mode"] = pl.Buffered(3)

        kernel = functools.partial(
            _stats_kernel, epsilon=float(epsilon), ts=ts,
            tiles_per_core=tiles_per_core, valid_elems=hwc,
            has_ragged=has_ragged)

        return pl.pallas_call(
            kernel,
            out_shape=jax.ShapeDtypeStruct((num_cores, 3, n, _LANE), jnp.float32),
            grid_spec=pltpu.PrefetchScalarGridSpec(
                num_scalar_prefetch=0,
                grid=(num_cores, n_tiles, tiles_per_core),
                in_specs=[
                    pl.BlockSpec((nb, ts, _LANE), in_map, **bs_kwargs),
                    pl.BlockSpec((nb, ts, _LANE), in_map, **bs_kwargs),
                ],
                out_specs=pl.BlockSpec((1, 3, nb, _LANE),
                                       lambda p, j, k: (p, 0, j, 0)),
            ),
            compiler_params=pltpu.CompilerParams(
                dimension_semantics=(core_sem, pltpu.PARALLEL, pltpu.ARBITRARY),
                vmem_limit_bytes=vmem_limit),
            cost_estimate=pl.CostEstimate(
                flops=6 * n * hwc,
                transcendentals=0,
                bytes_accessed=n * hwc_p * (np.dtype(y_pred.dtype).itemsize
                                            + np.dtype(y_true.dtype).itemsize)
                               + num_cores * 3 * n * _LANE * 4),
        )(yp3, yt3)

    try:
        stats = run(detected_cores, extra_buffer=True)
    except Exception:
        # Safe fallback: single core split, default double-buffering.
        stats = run(1, extra_buffer=False)

    # ---- tiny O(N*2) finalize in plain JAX ----
    s = stats.sum(axis=0)                              # combine cores -> (3, n, 128)
    s = s.reshape(3, n, _LANE // 2, 2).sum(axis=2)     # class = lane parity -> (3, n, 2)
    tp, sum_yt, sum_yp = s[0], s[1], s[2]

    fn = sum_yt - tp                                   # == sum(yt * (1 - yp_clipped))
    fp = sum_yp - tp                                   # == sum((1 - yt) * yp_clipped)
    dice = (tp + epsilon) / (tp + delta * fn + (1.0 - delta) * fp + epsilon)
    # Faithful to the PyTorch source: (1 - d) * (1 - d) ** (-gamma).
    # NOTE: yields NaN when dice == 1 exactly (0 * inf), same as the reference.
    focal = (1.0 - dice) * jnp.power(1.0 - dice, -gamma)
    return jnp.mean(focal)


def _reference(y_pred, y_true, *, delta=0.7, gamma=0.75, epsilon=1e-07):
    """Pure-JAX transcription of the PyTorch forward (for verification)."""
    yp = jnp.clip(y_pred.astype(jnp.float32), epsilon, 1.0 - epsilon)
    yt = y_true.astype(jnp.float32)
    tp = jnp.sum(yt * yp, axis=(1, 2))
    fn = jnp.sum(yt * (1.0 - yp), axis=(1, 2))
    fp = jnp.sum((1.0 - yt) * yp, axis=(1, 2))
    dice = (tp + epsilon) / (tp + delta * fn + (1.0 - delta) * fp + epsilon)
    back = (1.0 - dice[:, 0]) * jnp.power(1.0 - dice[:, 0], -gamma)
    fore = (1.0 - dice[:, 1]) * jnp.power(1.0 - dice[:, 1], -gamma)
    return jnp.mean(jnp.stack([back, fore], axis=-1))


if __name__ == "__main__":
    key = jax.random.PRNGKey(0)

    cases = [
        ((2, 16, 16), jnp.float32, jnp.float32),    # 128-aligned, rows < 8 (full-dim tile)
        ((2, 32, 16), jnp.float32, jnp.float32),    # 128-aligned, rows == tile (clean path)
        ((2, 36, 16), jnp.float32, jnp.float32),    # ragged trailing row tile (in-kernel mask)
        ((2, 15, 15), jnp.float32, jnp.float32),    # H*W*C % 128 != 0 (lane-tail mask)
        ((2, 16, 16), jnp.bfloat16, jnp.bfloat16),  # half-byte inputs (HBM-roofline win)
    ]
    for (N, H, W), pdt, tdt in cases:
        k1, k2, key = jax.random.split(key, 3)
        logits = jax.random.normal(k1, (N, H, W, 2), dtype=jnp.float32)
        y_pred = jax.nn.softmax(logits, axis=-1).astype(pdt)     # class probabilities
        mask = (jax.random.uniform(k2, (N, H, W)) > 0.5).astype(jnp.float32)
        y_true = jnp.stack([1.0 - mask, mask], axis=-1).astype(tdt)  # one-hot targets

        loss = jax.block_until_ready(symmetric_focal_tversky_loss(y_pred, y_true))
        ref = jax.block_until_ready(_reference(y_pred, y_true))
        np.testing.assert_allclose(np.asarray(loss), np.asarray(ref),
                                   rtol=1e-4, atol=1e-5)

    print("KERNEL_OK")
</pallas_src>

<mosaic_0001>
module attributes {stable_mosaic.version = 11 : i64} {
  func.func @_stats_kernel(%arg0: i32, %arg1: i32, %arg2: i32, %arg3: memref<2x4x128xf32, #tpu.memory_space<vmem>>, %arg4: memref<2x4x128xf32, #tpu.memory_space<vmem>>, %arg5: memref<1x3x2x128xf32, #tpu.memory_space<vmem>>) attributes {dimension_semantics = [#tpu.dimension_semantics<arbitrary>, #tpu.dimension_semantics<parallel>, #tpu.dimension_semantics<arbitrary>], iteration_bounds = array<i64: 1, 1, 1>, scalar_prefetch = 0 : i64, scratch_operands = 0 : i64, tpu.core_type = #tpu.core_type<tc>, window_params = [{transform_indices = @transform_0, window_bounds = array<i64: 2, 4, 128>}, {transform_indices = @transform_1, window_bounds = array<i64: 2, 4, 128>}, {transform_indices = @transform_2, window_bounds = array<i64: 1, 3, 2, 128>}]} {
    %c0_i32 = arith.constant 0 : i32
    %0 = arith.cmpi eq, %arg2, %c0_i32 : i32
    %1 = arith.extui %0 : i1 to i32
    %c0_i32_0 = arith.constant 0 : i32
    %2 = arith.cmpi ne, %1, %c0_i32_0 : i32
    scf.if %2 {
      %cst_32 = arith.constant 0.000000e+00 : f32
      %31 = vector.broadcast %cst_32 : f32 to vector<1x3x2x128xf32>
      %c0_33 = arith.constant 0 : index
      %c0_34 = arith.constant 0 : index
      %c0_35 = arith.constant 0 : index
      %c0_36 = arith.constant 0 : index
      %32 = vector.load %arg5[%c0_33, %c0_34, %c0_35, %c0_36] : memref<1x3x2x128xf32, #tpu.memory_space<vmem>>, vector<1x3x2x128xf32>
      tpu.vector_store %arg5[%c0_33, %c0_34, %c0_35, %c0_36], %31 {strides = array<i32>} : memref<1x3x2x128xf32, #tpu.memory_space<vmem>>, vector<1x3x2x128xf32>,
    } else {
    }
    %c0 = arith.constant 0 : index
    %c0_1 = arith.constant 0 : index
    %c0_2 = arith.constant 0 : index
    %3 = vector.load %arg3[%c0, %c0_1, %c0_2] : memref<2x4x128xf32, #tpu.memory_space<vmem>>, vector<2x4x128xf32>
    %c0_3 = arith.constant 0 : index
    %c0_4 = arith.constant 0 : index
    %c0_5 = arith.constant 0 : index
    %4 = vector.load %arg4[%c0_3, %c0_4, %c0_5] : memref<2x4x128xf32, #tpu.memory_space<vmem>>, vector<2x4x128xf32>
    %cst = arith.constant 1.000000e-07 : f32
    %cst_6 = arith.constant 0.99999988 : f32
    %5 = vector.broadcast %cst : f32 to vector<2x4x128xf32>
    %6 = arith.maximumf %5, %3 : vector<2x4x128xf32>
    %7 = vector.broadcast %cst_6 : f32 to vector<2x4x128xf32>
    %8 = arith.minimumf %7, %6 : vector<2x4x128xf32>
    %c0_7 = arith.constant 0 : index
    %c0_8 = arith.constant 0 : index
    %c0_9 = arith.constant 0 : index
    %c0_10 = arith.constant 0 : index
    %9 = vector.load %arg5[%c0_7, %c0_8, %c0_9, %c0_10] : memref<1x3x2x128xf32, #tpu.memory_space<vmem>>, vector<1x1x2x128xf32>
    %10 = vector.shape_cast %9 : vector<1x1x2x128xf32> to vector<2x128xf32>
    %11 = arith.mulf %4, %8 : vector<2x4x128xf32>
    %cst_11 = arith.constant dense<0.000000e+00> : vector<2x128xf32>
    %12 = vector.multi_reduction <add>, %11, %cst_11 [1] : vector<2x4x128xf32> to vector<2x128xf32>
    %13 = arith.addf %10, %12 : vector<2x128xf32>
    %c0_12 = arith.constant 0 : index
    %c0_13 = arith.constant 0 : index
    %c0_14 = arith.constant 0 : index
    %c0_15 = arith.constant 0 : index
    %14 = vector.load %arg5[%c0_12, %c0_13, %c0_14, %c0_15] : memref<1x3x2x128xf32, #tpu.memory_space<vmem>>, vector<1x1x2x128xf32>
    %15 = vector.shape_cast %14 : vector<1x1x2x128xf32> to vector<2x128xf32>
    %16 = vector.shape_cast %13 : vector<2x128xf32> to vector<1x1x2x128xf32>
    tpu.vector_store %arg5[%c0_12, %c0_13, %c0_14, %c0_15], %16 {strides = array<i32>} : memref<1x3x2x128xf32, #tpu.memory_space<vmem>>, vector<1x1x2x128xf32>,
    %c0_16 = arith.constant 0 : index
    %c1 = arith.constant 1 : index
    %c0_17 = arith.constant 0 : index
    %c0_18 = arith.constant 0 : index
    %17 = vector.load %arg5[%c0_16, %c1, %c0_17, %c0_18] : memref<1x3x2x128xf32, #tpu.memory_space<vmem>>, vector<1x1x2x128xf32>
    %18 = vector.shape_cast %17 : vector<1x1x2x128xf32> to vector<2x128xf32>
    %cst_19 = arith.constant dense<0.000000e+00> : vector<2x128xf32>
    %19 = vector.multi_reduction <add>, %4, %cst_19 [1] : vector<2x4x128xf32> to vector<2x128xf32>
    %20 = arith.addf %18, %19 : vector<2x128xf32>
    %c0_20 = arith.constant 0 : index
    %c1_21 = arith.constant 1 : index
    %c0_22 = arith.constant 0 : index
    %c0_23 = arith.constant 0 : index
    %21 = vector.load %arg5[%c0_20, %c1_21, %c0_22, %c0_23] : memref<1x3x2x128xf32, #tpu.memory_space<vmem>>, vector<1x1x2x128xf32>
    %22 = vector.shape_cast %21 : vector<1x1x2x128xf32> to vector<2x128xf32>
    %23 = vector.shape_cast %20 : vector<2x128xf32> to vector<1x1x2x128xf32>
    tpu.vector_store %arg5[%c0_20, %c1_21, %c0_22, %c0_23], %23 {strides = array<i32>} : memref<1x3x2x128xf32, #tpu.memory_space<vmem>>, vector<1x1x2x128xf32>,
    %c0_24 = arith.constant 0 : index
    %c2 = arith.constant 2 : index
    %c0_25 = arith.constant 0 : index
    %c0_26 = arith.constant 0 : index
    %24 = vector.load %arg5[%c0_24, %c2, %c0_25, %c0_26] : memref<1x3x2x128xf32, #tpu.memory_space<vmem>>, vector<1x1x2x128xf32>
    %25 = vector.shape_cast %24 : vector<1x1x2x128xf32> to vector<2x128xf32>
    %cst_27 = arith.constant dense<0.000000e+00> : vector<2x128xf32>
    %26 = vector.multi_reduction <add>, %8, %cst_27 [1] : vector<2x4x128xf32> to vector<2x128xf32>
    %27 = arith.addf %25, %26 : vector<2x128xf32>
    %c0_28 = arith.constant 0 : index
    %c2_29 = arith.constant 2 : index
    %c0_30 = arith.constant 0 : index
    %c0_31 = arith.constant 0 : index
    %28 = vector.load %arg5[%c0_28, %c2_29, %c0_30, %c0_31] : memref<1x3x2x128xf32, #tpu.memory_space<vmem>>, vector<1x1x2x128xf32>
    %29 = vector.shape_cast %28 : vector<1x1x2x128xf32> to vector<2x128xf32>
    %30 = vector.shape_cast %27 : vector<2x128xf32> to vector<1x1x2x128xf32>
    tpu.vector_store %arg5[%c0_28, %c2_29, %c0_30, %c0_31], %30 {strides = array<i32>} : memref<1x3x2x128xf32, #tpu.memory_space<vmem>>, vector<1x1x2x128xf32>,
    return
  }
  func.func @transform_0(%arg0: i32, %arg1: i32, %arg2: i32) -> (i32, i32, i32) {
    %c1_i32 = arith.constant 1 : i32
    %0 = arith.muli %arg0, %c1_i32 : i32
    %1 = arith.addi %0, %arg2 : i32
    %c0_i32 = arith.constant 0 : i32
    %c0_i32_0 = arith.constant 0 : i32
    return %arg1, %1, %c0_i32 : i32, i32, i32
  }
  func.func @transform_1(%arg0: i32, %arg1: i32, %arg2: i32) -> (i32, i32, i32) {
    %c1_i32 = arith.constant 1 : i32
    %0 = arith.muli %arg0, %c1_i32 : i32
    %1 = arith.addi %0, %arg2 : i32
    %c0_i32 = arith.constant 0 : i32
    %c0_i32_0 = arith.constant 0 : i32
    return %arg1, %1, %c0_i32 : i32, i32, i32
  }
  func.func @transform_2(%arg0: i32, %arg1: i32, %arg2: i32) -> (i32, i32, i32, i32) {
    %c0_i32 = arith.constant 0 : i32
    %c0_i32_0 = arith.constant 0 : i32
    %c0_i32_1 = arith.constant 0 : i32
    return %arg0, %c0_i32, %arg1, %c0_i32_0 : i32, i32, i32, i32
  }
}

</mosaic_0001>

<bundles_post_ra>
// kernel: tpu_custom_call.1
= control target key start
LH: loop header
LB: loop body
LE: loop exit
PB: predicated region body
PF: predicated region fallthrough
CT: control target
= control target key end

     0   :  { %7 = vsyncpa [#allocation3], 0  ;;  %s283_s0 = inlined_call_operand.hbm [shape: f32[2,4,128], index: 0, kind: input, shape index: {}]   ;;  %s284_s1 = inlined_call_operand.hbm [shape: f32[2,4,128], index: 1, kind: input, shape index: {}]   ;;  %s285_s2 = inlined_call_operand.hbm [shape: f32[1,3,2,128], index: 2, kind: output, shape index: {}]  }
   0x1   :  { %8 = vsyncpa [#allocation6], 0 }
   0x2   :  { %9 = vsyncpa [#allocation4], 0  ;;  %s17_s11 = sshll.u32 %s283_s0, 4  ;;  %s242_s12 = smov [#allocation2]   ;;  %s18_s11 = int_to_ptr.hbm [resolvable:$true] %s17_s11 }
   0x3   :  { %s19_s13 = sshll.u32 %s242_s12, 4  ;;  %s33_s16 = sshll.u32 %s284_s1, 4  ;;  %s20_s13 = int_to_ptr.vmem [resolvable:$true] %s19_s13  ;;  %s34_s16 = int_to_ptr.hbm [resolvable:$true] %s33_s16 }
   0x4   :  { %s243_s17 = smov 64   ;;  %s244_s18 = smov 4  }
   0x5   :  { %25 = dma.hbm_to_vmem [thread:$0]  %s18_s11, 128, %s20_s13, [#allocation3], %s243_s17, %s243_s17, %s244_s18  }
   0x6   :  { %s245_s19 = smov [#allocation5]  }
   0x7   :  { %s35_s20 = sshll.u32 %s245_s19, 4  ;;  %s36_s20 = int_to_ptr.vmem [resolvable:$true] %s35_s20 }
   0x8   :  { %41 = dma.hbm_to_vmem [thread:$0]  %s34_s16, 128, %s36_s20, [#allocation6], %s243_s17, %s243_s17, %s244_s18  }
   0x9   :  { %236 = dma.done.wait [#allocation3], 128  }
   0xa   :  { %237 = vsyncadd [#allocation3], 4294967168 }
   0xb   :  { %238 = dma.done.wait [#allocation6], 128  }
   0xc   :  { %239 = vsyncadd [#allocation6], 4294967168  ;;  %v246_v0 = vmov 0.0   ;;  %vm70_vm0 = vcmask 1043456   ;;  %v59_v1 = vld [vmem:[#allocation2] sm:$0xf] }
   0xd   :  { %56 = vst [vmem:[#allocation7] sm:$0x3] %v246_v0  ;;  %v60_v2 = vld [vmem:[#allocation2 + $0x4] sm:$0xf]  ;;  %v61_v3 = vld [vmem:[#allocation5] sm:$0xf] }
   0xe   :  { %57 = vst [vmem:[#allocation7 + $0x2] sm:$0x3] %v246_v0  ;;  %v62_v4 = vld [vmem:[#allocation5 + $0x4] sm:$0xf]  ;;  %v63_v5 = vmax.f32 %v59_v1, 1e-07 }
   0xf   :  { %58 = vst [vmem:[#allocation7 + $0x4] sm:$0x3] %v246_v0  ;;  %v64_v6 = vmax.f32 %v60_v2, 1e-07  ;;  %v94_v7 = vsel %vm70_vm0, %v61_v3, 0.0  ;;  %v101_v8 = vsel %vm70_vm0, %v62_v4, 0.0 }
  0x10   :  { %v65_v9 = vmin.f32 %v63_v5, 0.9999999  ;;  %v95_v11 = vrot.slane %v94_v7, 4  ;;  %v102_v12 = vrot.slane %v101_v8, 4  ;;  %vm87_vm1 = vcmask 1041409   ;;  %s247_s0 = smov [#allocation7]  }
  0x11   :  { %v66_v10 = vmin.f32 %v64_v6, 0.9999999  ;;  %s140_s1 = sshll.u32 %s247_s0, 4  ;;  %s142_s23 = sshll.u32 %s285_s2, 4  ;;  %s141_s1 = int_to_ptr.vmem [resolvable:$true] %s140_s1  ;;  %s143_s23 = int_to_ptr.hbm [resolvable:$true] %s142_s23 }
  0x12   :  { %v68_v13 = vmul.f32 %v65_v9, %v61_v3  ;;  %v96_v15 = vadd.f32 %v95_v11, %v94_v7  ;;  %v103_v16 = vadd.f32 %v102_v12, %v101_v8  ;;  %v116_v17 = vsel %vm70_vm0, %v65_v9, 0.0  ;;  %s248_s24 = smov 32   ;;  %s249_s25 = smov 2  }
  0x13   :  { %v69_v14 = vmul.f32 %v66_v10, %v62_v4  ;;  %v123_v18 = vsel %vm70_vm0, %v66_v10, 0.0  ;;  %v117_v25 = vrot.slane %v116_v17, 4 }
  0x14   :  { %v71_v19 = vsel %vm70_vm0, %v68_v13, 0.0  ;;  %v97_v21 = vrot.slane %v96_v15, 2  ;;  %v104_v22 = vrot.slane %v103_v16, 2  ;;  %v124_v26 = vrot.slane %v123_v18, 4  ;;  %v67_v52 = vld [vmem:[#allocation7] sm:$0x3] }
  0x15   :  { %v78_v20 = vsel %vm70_vm0, %v69_v14, 0.0  ;;  %v72_v23 = vrot.slane %v71_v19, 4  ;;  %v118_v31 = vadd.f32 %v117_v25, %v116_v17  ;;  %v93_v39 = vld [vmem:[#allocation7 + $0x2] sm:$0x3] }
  0x16   :  { %v79_v24 = vrot.slane %v78_v20, 4  ;;  %v98_v27 = vadd.f32 %v97_v21, %v96_v15  ;;  %v105_v28 = vadd.f32 %v104_v22, %v103_v16  ;;  %v125_v32 = vadd.f32 %v124_v26, %v123_v18  ;;  %v115_v56 = vld [vmem:[#allocation7 + $0x4] sm:$0x3] }
  0x17   :  { %v73_v29 = vadd.f32 %v72_v23, %v71_v19  ;;  %v119_v37 = vrot.slane %v118_v31, 2 }
  0x18   :  { %v80_v30 = vadd.f32 %v79_v24, %v78_v20  ;;  %v99_v33 = vrot.slane %v98_v27, 1  ;;  %v106_v34 = vrot.slane %v105_v28, 1  ;;  %v126_v38 = vrot.slane %v125_v32, 2 }
  0x19   :  { %v74_v35 = vrot.slane %v73_v29, 2  ;;  %v120_v44 = vadd.f32 %v119_v37, %v118_v31 }
  0x1a   :  { %v81_v36 = vrot.slane %v80_v30, 2  ;;  %v100_v40 = vadd.f32 %v99_v33, %v98_v27  ;;  %v107_v41 = vadd.f32 %v106_v34, %v105_v28  ;;  %v127_v45 = vadd.f32 %v126_v38, %v125_v32 }
  0x1b   :  { %v75_v42 = vadd.f32 %v74_v35, %v73_v29  ;;  %v121_v50 = vrot.slane %v120_v44, 1 }
  0x1c   :  { %v82_v43 = vadd.f32 %v81_v36, %v80_v30  ;;  %v110_v46 = vsel %vm87_vm1, %v107_v41, %v100_v40  ;;  %v128_v51 = vrot.slane %v127_v45, 1 }
  0x1d   :  { %v76_v47 = vrot.slane %v75_v42, 1  ;;  %v112_v49 = vadd.f32 %v110_v46, %v93_v39  ;;  %v122_v55 = vadd.f32 %v121_v50, %v120_v44 }
  0x1e   :  { %v83_v48 = vrot.slane %v82_v43, 1  ;;  %v129_v57 = vadd.f32 %v128_v51, %v127_v45 }
  0x1f   :  { %v77_v53 = vadd.f32 %v76_v47, %v75_v42  ;;  %113 = vst [vmem:[#allocation7 + $0x2] sm:$0x3] %v112_v49 }
  0x20   :  { %v84_v54 = vadd.f32 %v83_v48, %v82_v43  ;;  %v132_v60 = vsel %vm87_vm1, %v129_v57, %v122_v55 }
  0x21   :  { %v134_v61 = vadd.f32 %v132_v60, %v115_v56 }
  0x22   :  { %v88_v58 = vsel %vm87_vm1, %v84_v54, %v77_v53 }
  0x23   :  { %v90_v59 = vadd.f32 %v88_v58, %v67_v52  ;;  %135 = vst [vmem:[#allocation7 + $0x4] sm:$0x3] %v134_v61 }
  0x25   :  { %91 = vst [vmem:[#allocation7] sm:$0x3] %v90_v59 }
  0x26   :  { %148 = dma.vmem_to_hbm [thread:$0]  %s141_s1, 96, %s143_s23, [#allocation4], %s248_s24, %s248_s24, %s249_s25  }
  0x27   :  { %240 = dma.done.wait [#allocation4], 96  }
  0x28   :  { %241 = vsyncadd [#allocation4], 4294967200 }
  0x29   :  { %153 = vsyncpa [#allocation3], 1 }
  0x2a   :  { %154 = vsyncpa [#allocation6], 1 }
  0x2b   :  { %155 = vsyncpa [#allocation4], 1 }

</bundles_post_ra>
